<compile_context>
chip_gen: v7x
topology: tpu7x:2x2x1
jax: 0.10.0
libtpu: 0.0.40
codegen_flags: <defaults>
</compile_context>

<pallas_src>
import functools

import jax
import jax.numpy as jnp
from jax import lax
from jax.experimental import pallas as pl
from jax.experimental.pallas import tpu as pltpu


def _round_up(x, m):
    return ((x + m - 1) // m) * m


def _gpt_head_kernel(h_ref, wt_ref, lb_ref, out_ref, hn_ref, *, eps, inv_d):
    """Final LayerNorm (affine pre-folded into W/b) + lm_head matmul.

    Grid = (row tiles [parallel], vocab tiles [arbitrary, innermost]).  The
    normalized, bf16-cast activations are computed once per row tile and
    cached in the VMEM scratch `hn_ref`, then reused for all vocab tiles.
    """

    @pl.when(pl.program_id(1) == 0)
    def _():
        h = h_ref[...]  # (tile_r, D) f32
        # One-pass moments: both lane reductions run on h (no serial dep).
        mean = jnp.sum(h, axis=-1, keepdims=True) * inv_d
        mean_sq = jnp.sum(h * h, axis=-1, keepdims=True) * inv_d
        var = mean_sq - mean * mean
        inv = lax.rsqrt(var + eps)  # EUP slot
        hn_ref[...] = ((h - mean) * inv).astype(jnp.bfloat16)

    # MXU: bf16 x bf16 -> f32 accumulation. gamma is folded into wt_ref,
    # beta (and the lm_head bias) are folded into lb_ref.
    acc = jnp.dot(hn_ref[...], wt_ref[...], preferred_element_type=jnp.float32)
    out_ref[...] = (acc + lb_ref[...]).astype(out_ref.dtype)


def _vmem_bytes(tile_r, tile_v, d, out_bytes):
    """Approximate double-buffered VMEM footprint of one grid step."""
    h_t = tile_r * d * 4              # f32 activation tile
    w_t = d * tile_v * 2              # bf16 weight tile
    b_t = 8 * max(tile_v, 128) * 4    # (1, tile_v) f32 bias, sublane-padded
    o_t = tile_r * tile_v * out_bytes
    hn = tile_r * d * 2               # bf16 LN cache (single-buffered scratch)
    return 2 * (h_t + w_t + b_t + o_t) + hn


def gpt_forward(
    token_ids,
    params,
    *,
    block_size,
    n_layer,
    eps=1e-5,
    tile_rows=256,
    tile_vocab=1024,
    out_dtype=jnp.bfloat16,
    vmem_budget_bytes=40 * 1024 * 1024,   # conservative: fits v7x's 64 MiB VMEM
    vmem_limit_bytes=None,
):
    """Forward pass matching MyLLM GPT.forward (name == 'gpt2' path)."""
    B, T = token_ids.shape
    if T > block_size:
        raise ValueError(
            f"Cannot attend to {T} tokens, block size is only {block_size}."
        )
    if "lm_wt" not in params:
        raise ValueError("params must be processed by prepare_params() first.")

    wte = params["wte"]      # (padded_vocab_size, n_embd) f32
    wpe = params["wpe"]      # (block_size, n_embd) f32
    lm_wt = params["lm_wt"]  # (n_embd, Vp) bf16: gamma-folded, vocab-padded W.T
    lm_lb = params["lm_lb"]  # (1, Vp) f32: lm_b + beta @ W.T, vocab-padded

    D = wte.shape[1]
    v_in, Vp = lm_wt.shape
    out_dim = int(params["lm_out_dim"])
    if v_in != D:
        # The reference lm_head only type-checks when padded_vocab_size == n_embd.
        raise ValueError(
            f"lm_head requires padded_vocab_size ({v_in}) == n_embd ({D})."
        )

    N = B * T

    # Embedding gather + fused position-embedding add (glue, plain JAX):
    # a single (N, D) f32 activation stream feeds the kernel.
    tok_emb = jnp.take(wte, token_ids.reshape(-1), axis=0).reshape(B, T, D)
    h = (tok_emb + wpe[:T][None, :, :]).reshape(N, D)

    # transformer blocks: identity (see TODO(synk) above)
    for _ in range(n_layer):
        pass

    # --- tiling (tail-safe, lane-dense, VMEM-budgeted) ---------------------
    out_bytes = jnp.dtype(out_dtype).itemsize

    # Row tiles: multiples of 16 (bf16 sublane packing); big tiles amortize
    # per-step overhead and cut weight re-stream count.
    tile_r = _round_up(min(tile_rows, _round_up(N, 16)), 16)

    # Vocab tiles: lane-dense multiples of 128 that divide the pre-padded Vp.
    tile_v = min(_round_up(tile_vocab, 128), Vp)
    while tile_v > 128 and (
        Vp % tile_v != 0
        or _vmem_bytes(tile_r, tile_v, D, out_bytes) > vmem_budget_bytes
    ):
        tile_v -= 128
    while tile_r > 16 and _vmem_bytes(tile_r, tile_v, D, out_bytes) > vmem_budget_bytes:
        tile_r = max(16, _round_up(tile_r // 2, 16))

    if vmem_limit_bytes is None:
        need = _vmem_bytes(tile_r, tile_v, D, out_bytes)
        vmem_limit_bytes = min(need + need // 4 + (2 << 20), 64 << 20)

    grid = (pl.cdiv(N, tile_r), Vp // tile_v)

    out = pl.pallas_call(
        functools.partial(_gpt_head_kernel, eps=eps, inv_d=1.0 / D),
        out_shape=jax.ShapeDtypeStruct((N, Vp), out_dtype),
        grid_spec=pltpu.PrefetchScalarGridSpec(
            num_scalar_prefetch=0,
            grid=grid,
            in_specs=[
                # fused embeddings: rows tiled, full D in lanes; resident
                # across the inner vocab loop (block index constant in j)
                pl.BlockSpec((tile_r, D), lambda i, j: (i, 0)),
                # lm_head W.T tile (gamma folded): (D, tile_v) bf16
                pl.BlockSpec((D, tile_v), lambda i, j: (0, j)),
                # folded bias tile
                pl.BlockSpec((1, tile_v), lambda i, j: (0, j)),
            ],
            out_specs=pl.BlockSpec((tile_r, tile_v), lambda i, j: (i, j)),
            scratch_shapes=[pltpu.VMEM((tile_r, D), jnp.bfloat16)],
        ),
        compiler_params=pltpu.CompilerParams(
            # rows parallel (megacore / 2-TC sharding); vocab must be a
            # sequential inner loop so the hn cache is valid across it.
            dimension_semantics=("parallel", "arbitrary"),
            vmem_limit_bytes=vmem_limit_bytes,
        ),
    )(h, lm_wt, lm_lb)

    return out[:, :out_dim].reshape(B, T, out_dim)


def init_params(key, *, padded_vocab_size, n_embd, block_size):
    """Deterministic parameter init mirroring the module's __init__ shapes."""
    k_wte, k_wpe, k_lmw, k_lmb, k_g, k_b = jax.random.split(key, 6)
    params = {
        # nn.Embedding(padded_vocab_size, n_embd)
        "wte": 0.02 * jax.random.normal(k_wte, (padded_vocab_size, n_embd), jnp.float32),
        # nn.Embedding(block_size, n_embd)   (only used when config.name == 'gpt2')
        "wpe": 0.02 * jax.random.normal(k_wpe, (block_size, n_embd), jnp.float32),
        # config.norm_class(n_embd) -> LayerNorm affine params (randomized so
        # the prep-time affine fold is actually exercised)
        "ln_g": 1.0 + 0.1 * jax.random.normal(k_g, (n_embd,), jnp.float32),
        "ln_b": 0.05 * jax.random.normal(k_b, (n_embd,), jnp.float32),
        # nn.Linear(padded_vocab_size, n_embd).weight : (n_embd, padded_vocab_size)
        "lm_w": 0.02 * jax.random.normal(k_lmw, (n_embd, padded_vocab_size), jnp.float32),
        "lm_b": 0.02 * jax.random.normal(k_lmb, (n_embd,), jnp.float32),
    }
    return params


def prepare_params(params):
    """One-time parameter prep (outside the forward pass):

      * transpose the lm_head weight,
      * fold the LayerNorm affine into it (f32 fold, THEN cast to bf16):
            logits = ((x-mu)/std) @ (gamma[:,None] * W.T) + (beta @ W.T + b)
      * pad the vocab/output axis to a multiple of 128 (lane-dense tiles,
        no per-call padding copies),
      * cast the weight to bf16.
    """
    wt = params["lm_w"].T.astype(jnp.float32)          # (padded_vocab, n_embd)
    gamma = params["ln_g"].astype(jnp.float32)         # (n_embd,)
    beta = params["ln_b"].astype(jnp.float32)          # (n_embd,)
    if wt.shape[0] != gamma.shape[0]:
        raise ValueError(
            f"lm_head requires padded_vocab_size ({wt.shape[0]}) == n_embd "
            f"({gamma.shape[0]})."
        )

    wt_folded = gamma[:, None] * wt                          # f32 fold
    lb_folded = params["lm_b"].astype(jnp.float32) + beta @ wt

    out_dim = wt_folded.shape[1]
    Vp = _round_up(out_dim, 128)
    if Vp != out_dim:
        wt_folded = jnp.pad(wt_folded, ((0, 0), (0, Vp - out_dim)))
        lb_folded = jnp.pad(lb_folded, ((0, Vp - out_dim),))

    prepped = dict(params)
    prepped["lm_wt"] = wt_folded.astype(jnp.bfloat16)        # (n_embd, Vp)
    prepped["lm_lb"] = lb_folded.reshape(1, Vp)              # (1, Vp) f32
    prepped["lm_out_dim"] = int(out_dim)
    return prepped


if __name__ == "__main__":
    # Small synthetic config (name='gpt2' path). The literal lm_head requires
    # padded_vocab_size == n_embd; 256 keeps the lane dim fully dense.
    B, T = 2, 8
    N_EMBD = 256
    PADDED_VOCAB = 256
    BLOCK_SIZE = 16
    N_LAYER = 2
    EPS = 1e-5

    key = jax.random.PRNGKey(0)
    k_params, k_tokens = jax.random.split(key)
    raw = init_params(
        k_params,
        padded_vocab_size=PADDED_VOCAB,
        n_embd=N_EMBD,
        block_size=BLOCK_SIZE,
    )
    params = prepare_params(raw)
    token_ids = jax.random.randint(k_tokens, (B, T), 0, PADDED_VOCAB, dtype=jnp.int32)

    logits = gpt_forward(
        token_ids,
        params,
        block_size=BLOCK_SIZE,
        n_layer=N_LAYER,
        eps=EPS,
        tile_rows=256,
        tile_vocab=1024,
    )
    jax.block_until_ready(logits)

    assert logits.shape == (B, T, N_EMBD), logits.shape
    logits_f32 = logits.astype(jnp.float32)
    assert bool(jnp.all(jnp.isfinite(logits_f32)))

    # Pure-JAX reference (f32, unfused) to validate the affine fold + kernel.
    tok = jnp.take(raw["wte"], token_ids.reshape(-1), axis=0).reshape(B, T, N_EMBD)
    h_ref = tok + raw["wpe"][:T][None, :, :]
    mu = jnp.mean(h_ref, axis=-1, keepdims=True)
    var = jnp.mean((h_ref - mu) ** 2, axis=-1, keepdims=True)
    hn = (h_ref - mu) * lax.rsqrt(var + EPS) * raw["ln_g"] + raw["ln_b"]
    ref = hn @ raw["lm_w"].T + raw["lm_b"]
    max_err = float(jnp.max(jnp.abs(logits_f32 - ref)))
    assert max_err < 5e-2, f"max abs error vs reference: {max_err}"

    print("KERNEL_OK")
</pallas_src>

<mosaic_0001>
module attributes {stable_mosaic.version = 11 : i64} {
  func.func @_gpt_head_kernel(%arg0: i32, %arg1: i32, %arg2: memref<16x256xf32, #tpu.memory_space<vmem>>, %arg3: memref<256x256xbf16, #tpu.memory_space<vmem>>, %arg4: memref<1x256xf32, #tpu.memory_space<vmem>>, %arg5: memref<16x256xbf16, #tpu.memory_space<vmem>>, %arg6: memref<16x256xbf16, #tpu.memory_space<vmem>>) attributes {dimension_semantics = [#tpu.dimension_semantics<parallel>, #tpu.dimension_semantics<arbitrary>], iteration_bounds = array<i64: 1, 1>, scalar_prefetch = 0 : i64, scratch_operands = 1 : i64, tpu.core_type = #tpu.core_type<tc>, window_params = [{transform_indices = @transform_0, window_bounds = array<i64: 16, 256>}, {transform_indices = @transform_1, window_bounds = array<i64: 256, 256>}, {transform_indices = @transform_2, window_bounds = array<i64: 1, 256>}, {transform_indices = @transform_3, window_bounds = array<i64: 16, 256>}]} {
    %c0_i32 = arith.constant 0 : i32
    %0 = arith.cmpi eq, %arg1, %c0_i32 : i32
    %1 = arith.extui %0 : i1 to i32
    %c0_i32_0 = arith.constant 0 : i32
    %2 = arith.cmpi ne, %1, %c0_i32_0 : i32
    scf.if %2 {
      %c0_8 = arith.constant 0 : index
      %c0_9 = arith.constant 0 : index
      %11 = vector.load %arg2[%c0_8, %c0_9] : memref<16x256xf32, #tpu.memory_space<vmem>>, vector<16x256xf32>
      %cst_10 = arith.constant dense<0.000000e+00> : vector<16xf32>
      %12 = vector.multi_reduction <add>, %11, %cst_10 [1] : vector<16x256xf32> to vector<16xf32>
      %13 = vector.shape_cast %12 : vector<16xf32> to vector<16x1xf32>
      %cst_11 = arith.constant 3.906250e-03 : f32
      %14 = vector.broadcast %cst_11 : f32 to vector<16x1xf32>
      %15 = arith.mulf %13, %14 : vector<16x1xf32>
      %16 = arith.mulf %11, %11 : vector<16x256xf32>
      %cst_12 = arith.constant dense<0.000000e+00> : vector<16xf32>
      %17 = vector.multi_reduction <add>, %16, %cst_12 [1] : vector<16x256xf32> to vector<16xf32>
      %18 = vector.shape_cast %17 : vector<16xf32> to vector<16x1xf32>
      %cst_13 = arith.constant 3.906250e-03 : f32
      %19 = vector.broadcast %cst_13 : f32 to vector<16x1xf32>
      %20 = arith.mulf %18, %19 : vector<16x1xf32>
      %21 = arith.mulf %15, %15 : vector<16x1xf32>
      %22 = arith.subf %20, %21 : vector<16x1xf32>
      %cst_14 = arith.constant 9.99999974E-6 : f32
      %23 = vector.broadcast %cst_14 : f32 to vector<16x1xf32>
      %24 = arith.addf %22, %23 : vector<16x1xf32>
      %25 = math.rsqrt %24 : vector<16x1xf32>
      %26 = vector.broadcast %15 : vector<16x1xf32> to vector<16x256xf32>
      %27 = arith.subf %11, %26 : vector<16x256xf32>
      %28 = vector.broadcast %25 : vector<16x1xf32> to vector<16x256xf32>
      %29 = arith.mulf %27, %28 : vector<16x256xf32>
      %30 = arith.truncf %29 : vector<16x256xf32> to vector<16x256xbf16>
      %c0_15 = arith.constant 0 : index
      %c0_16 = arith.constant 0 : index
      %31 = vector.load %arg6[%c0_15, %c0_16] : memref<16x256xbf16, #tpu.memory_space<vmem>>, vector<16x256xbf16>
      tpu.vector_store %arg6[%c0_15, %c0_16], %30 {strides = array<i32>} : memref<16x256xbf16, #tpu.memory_space<vmem>>, vector<16x256xbf16>,
    } else {
    }
    %c0 = arith.constant 0 : index
    %c0_1 = arith.constant 0 : index
    %3 = vector.load %arg6[%c0, %c0_1] : memref<16x256xbf16, #tpu.memory_space<vmem>>, vector<16x256xbf16>
    %c0_2 = arith.constant 0 : index
    %c0_3 = arith.constant 0 : index
    %4 = vector.load %arg3[%c0_2, %c0_3] : memref<256x256xbf16, #tpu.memory_space<vmem>>, vector<256x256xbf16>
    %cst = arith.constant dense<0.000000e+00> : vector<16x256xf32>
    %5 = tpu.matmul %3, %4, %cst {dimension_numbers = #tpu.dot_dimension_numbers<[1], [0], [0], [1], [0, 0, 1, 1], [], []>} : vector<16x256xbf16>, vector<256x256xbf16>, vector<16x256xf32> -> vector<16x256xf32>
    %c0_4 = arith.constant 0 : index
    %c0_5 = arith.constant 0 : index
    %6 = vector.load %arg4[%c0_4, %c0_5] : memref<1x256xf32, #tpu.memory_space<vmem>>, vector<1x256xf32>
    %7 = vector.broadcast %6 : vector<1x256xf32> to vector<16x256xf32>
    %8 = arith.addf %5, %7 : vector<16x256xf32>
    %9 = arith.truncf %8 : vector<16x256xf32> to vector<16x256xbf16>
    %c0_6 = arith.constant 0 : index
    %c0_7 = arith.constant 0 : index
    %10 = vector.load %arg5[%c0_6, %c0_7] : memref<16x256xbf16, #tpu.memory_space<vmem>>, vector<16x256xbf16>
    tpu.vector_store %arg5[%c0_6, %c0_7], %9 {strides = array<i32>} : memref<16x256xbf16, #tpu.memory_space<vmem>>, vector<16x256xbf16>,
    return
  }
  func.func @transform_0(%arg0: i32, %arg1: i32) -> (i32, i32) {
    %c0_i32 = arith.constant 0 : i32
    %c0_i32_0 = arith.constant 0 : i32
    return %arg0, %c0_i32 : i32, i32
  }
  func.func @transform_1(%arg0: i32, %arg1: i32) -> (i32, i32) {
    %c0_i32 = arith.constant 0 : i32
    %c0_i32_0 = arith.constant 0 : i32
    return %c0_i32, %arg1 : i32, i32
  }
  func.func @transform_2(%arg0: i32, %arg1: i32) -> (i32, i32) {
    %c0_i32 = arith.constant 0 : i32
    %c0_i32_0 = arith.constant 0 : i32
    return %c0_i32, %arg1 : i32, i32
  }
  func.func @transform_3(%arg0: i32, %arg1: i32) -> (i32, i32) {
    %c0_i32 = arith.constant 0 : i32
    return %arg0, %arg1 : i32, i32
  }
}

</mosaic_0001>

<bundles_post_ra>
// kernel: tpu_custom_call.1
= control target key start
LH: loop header
LB: loop body
LE: loop exit
PB: predicated region body
PF: predicated region fallthrough
CT: control target
= control target key end

     0   :  { %8 = vsyncpa [#allocation4], 0  ;;  %s635_s0 = inlined_call_operand.hbm [shape: f32[16,256], index: 0, kind: input, shape index: {}]   ;;  %s636_s1 = inlined_call_operand.hbm [shape: bf16[256,256], index: 1, kind: input, shape index: {}]   ;;  %s637_s2 = inlined_call_operand.vmem [shape: f32[1,256], index: 2, kind: input, shape index: {}]   ;;  %s638_s3 = inlined_call_operand.hbm [shape: bf16[16,256], index: 3, kind: output, shape index: {}]  }
   0x1   :  { %9 = vsyncpa [#allocation7], 0 }
   0x2   :  { %10 = vsyncpa [#allocation5], 0  ;;  %s539_s12 = smov [#allocation3]   ;;  %s467_s16 = scalar_lea.hbm %s635_s0, 512 }
   0x3   :  { %s16_s13 = sshll.u32 %s539_s12, 4  ;;  %p468_p0 = scmp.ne.s32.totalorder %s635_s0, %s467_s16  ;;  %s17_s13 = int_to_ptr.vmem [resolvable:$true] %s16_s13 }
   0x4   :  { %p471_p1 = scmp.lt.u32.totalorder %s467_s16, %s635_s0 }
   0x6   :  { %p473_p2 = pnand %p471_p1, %p468_p0 }
   0x8   :  { %476 = shalt.err (!%p473_p2)
}
   0x9   :  { %s477_s21 = scalar_lea.vmem %s17_s13, 512  ;;  %p482_p4 = scmp.lt.s32.totalorder %s17_s13, %s17_s13 }
   0xa   :  { %p478_p3 = scmp.ne.s32.totalorder %s17_s13, %s477_s21  ;;  %p483_p5 = scmp.lt.s32.totalorder %s477_s21, %s477_s21 }
   0xc   :  { %p484_p6 = por %p483_p5, %p482_p4 }
   0xe   :  { %p485_p7 = pnand %p484_p6, %p478_p3 }
  0x10   :  { %488 = shalt.err (!%p485_p7)
}
  0x11   :  { %s540_s22 = smov 256   ;;  %s541_s23 = smov 16  }
  0x12   :  { %22 = dma.hbm_to_vmem [thread:$0]  %s635_s0, 512, %s17_s13, [#allocation4], %s540_s22, %s540_s22, %s541_s23  }
  0x13   :  { %s542_s26 = smov [#allocation6]   ;;  %s489_s30 = scalar_lea.hbm %s636_s1, 4096 }
  0x14   :  { %s28_s27 = sshll.u32 %s542_s26, 4  ;;  %p490_p8 = scmp.ne.s32.totalorder %s636_s1, %s489_s30  ;;  %s29_s27 = int_to_ptr.vmem [resolvable:$true] %s28_s27 }
  0x15   :  { %p493_p9 = scmp.lt.u32.totalorder %s489_s30, %s636_s1 }
  0x17   :  { %p495_p10 = pnand %p493_p9, %p490_p8 }
  0x19   :  { %498 = shalt.err (!%p495_p10)
}
  0x1a   :  { %s499_s8 = scalar_lea.vmem %s29_s27, 4096  ;;  %p504_p12 = scmp.lt.s32.totalorder %s29_s27, %s29_s27 }
  0x1b   :  { %p500_p11 = scmp.ne.s32.totalorder %s29_s27, %s499_s8  ;;  %p505_p13 = scmp.lt.s32.totalorder %s499_s8, %s499_s8 }
  0x1d   :  { %p506_p0 = por %p505_p13, %p504_p12 }
  0x1f   :  { %p507_p1 = pnand %p506_p0, %p500_p11 }
  0x21   :  { %510 = shalt.err (!%p507_p1)
}
  0x22   :  { %s543_s0 = smov 128   ;;  %s544_s9 = smov 8  }
  0x23   :  { %34 = dma.hbm_to_vmem [thread:$0]  %s636_s1, 4096, %s29_s27, [#allocation7], %s543_s0, %s543_s0, %s544_s9  }
  0x24   :  { %533 = dma.done.wait [#allocation4], 512  }
  0x25   :  { %534 = vsyncadd [#allocation4], 4294966784 }
  0x26   :  { %535 = dma.done.wait [#allocation7], 4096  }
  0x27   :  { %536 = vsyncadd [#allocation7], 4294963200  ;;  %v593_v0 = vld [vmem:[#allocation3] sm:$0xff]  ;;  %v595_v1 = vld [vmem:[#allocation3 + $0x8] sm:$0xff]  ;;  %s545_s13 = smov [#allocation8]  }
  0x28   :  { %v597_v2 = vld [vmem:[#allocation3 + $0x10] sm:$0xff]  ;;  %v51_v3 = vadd.f32 %v595_v1, %v593_v0  ;;  %v59_v4 = vmul.f32 %v593_v0, %v593_v0  ;;  %v60_v5 = vmul.f32 %v595_v1, %v595_v1  ;;  %v605_v6 = vld [vmem:[#allocation3 + $0x18] sm:$0xff]  ;;  %v415_v9 = vld [vmem:[#allocation6 + $0x4] ss:$8 sps:$4 sm:$0xff]   ;;  %s359_s14 = sshll.u32 %s545_s13, 4  ;;  %s360_s14 = int_to_ptr.vmem [resolvable:$true] %s359_s14 }
  0x29   :  { %v61_v7 = vmul.f32 %v597_v2, %v597_v2  ;;  %v62_v8 = vmul.f32 %v605_v6, %v605_v6  ;;  %v417_v10 = vld [vmem:[#allocation6] ss:$8 sps:$4 sm:$0xff]   ;;  %v54_v12 = vadd.f32 %v605_v6, %v597_v2  ;;  %v418_v13 = vld [vmem:[#allocation6 + $0x14] ss:$8 sps:$4 sm:$0xff]   ;;  %297 = vmatprep.subr.bf16.mxu0 %v415_v9  ;;  %v420_v15 = vld [vmem:[#allocation6 + $0x10] ss:$8 sps:$4 sm:$0xff]   ;;  %p516_p3 = scmp.lt.s32.totalorder %s360_s14, %s360_s14 }
  0x2a   :  { %52 = vadd.xlane.f32.xlu0 %v51_v3  ;;  %v63_v11 = vadd.f32 %v60_v5, %v59_v4  ;;  %298 = vmatpush1.bf16.msra.mxu0 %v417_v10  ;;  %v421_v16 = vld [vmem:[#allocation6 + $0x24] ss:$8 sps:$4 sm:$0xff]   ;;  %v423_v17 = vld [vmem:[#allocation6 + $0x20] ss:$8 sps:$4 sm:$0xff]   ;;  %v424_v18 = vld [vmem:[#allocation6 + $0x34] ss:$8 sps:$4 sm:$0xff]   ;;  %v127_v10 = vlaneseq }
  0x2b   :  { %v66_v14 = vadd.f32 %v62_v8, %v61_v7  ;;  %299 = vmatprep.subr.bf16.mxu0 %v418_v13  ;;  %v426_v19 = vld [vmem:[#allocation6 + $0x30] ss:$8 sps:$4 sm:$0xff]   ;;  %v427_v20 = vld [vmem:[#allocation6 + $0x44] ss:$8 sps:$4 sm:$0xff]   ;;  %v429_v21 = vld [vmem:[#allocation6 + $0x40] ss:$8 sps:$4 sm:$0xff]  }
  0x2c   :  { %64 = vadd.xlane.f32.xlu1 %v63_v11  ;;  %v430_v22 = vld [vmem:[#allocation6 + $0x54] ss:$8 sps:$4 sm:$0xff]   ;;  %v432_v23 = vld [vmem:[#allocation6 + $0x50] ss:$8 sps:$4 sm:$0xff]   ;;  %v433_v24 = vld [vmem:[#allocation6 + $0x64] ss:$8 sps:$4 sm:$0xff]  }
  0x2d   :  { %v435_v25 = vld [vmem:[#allocation6 + $0x60] ss:$8 sps:$4 sm:$0xff]   ;;  %v436_v26 = vld [vmem:[#allocation6 + $0x74] ss:$8 sps:$4 sm:$0xff]   ;;  %v438_v27 = vld [vmem:[#allocation6 + $0x70] ss:$8 sps:$4 sm:$0xff]  }
  0x2e   :  { %55 = vadd.xlane.f32.xlu0 %v54_v12  ;;  %300 = vmatpush1.bf16.msra.mxu0 %v420_v15  ;;  %v439_v28 = vld [vmem:[#allocation6 + $0x84] ss:$8 sps:$4 sm:$0xff]   ;;  %v441_v29 = vld [vmem:[#allocation6 + $0x80] ss:$8 sps:$4 sm:$0xff]   ;;  %v442_v30 = vld [vmem:[#allocation6 + $0x94] ss:$8 sps:$4 sm:$0xff]  }
  0x2f   :  { %301 = vmatprep.subr.bf16.mxu0 %v421_v16  ;;  %v444_v31 = vld [vmem:[#allocation6 + $0x90] ss:$8 sps:$4 sm:$0xff]   ;;  %v445_v32 = vld [vmem:[#allocation6 + $0xa4] ss:$8 sps:$4 sm:$0xff]   ;;  %v447_v33 = vld [vmem:[#allocation6 + $0xa0] ss:$8 sps:$4 sm:$0xff]  }
  0x30   :  { %67 = vadd.xlane.f32.xlu1 %v66_v14  ;;  %v448_v34 = vld [vmem:[#allocation6 + $0xb4] ss:$8 sps:$4 sm:$0xff]   ;;  %v450_v35 = vld [vmem:[#allocation6 + $0xb0] ss:$8 sps:$4 sm:$0xff]   ;;  %v451_v36 = vld [vmem:[#allocation6 + $0xc4] ss:$8 sps:$4 sm:$0xff]  }
  0x31   :  { %v453_v37 = vld [vmem:[#allocation6 + $0xc0] ss:$8 sps:$4 sm:$0xff]   ;;  %v454_v38 = vld [vmem:[#allocation6 + $0xd4] ss:$8 sps:$4 sm:$0xff]   ;;  %v456_v39 = vld [vmem:[#allocation6 + $0xd0] ss:$8 sps:$4 sm:$0xff]  }
  0x32   :  { %302 = vmatpush1.bf16.msra.mxu0 %v423_v17  ;;  %v457_v40 = vld [vmem:[#allocation6 + $0xe4] ss:$8 sps:$4 sm:$0xff]   ;;  %v459_v41 = vld [vmem:[#allocation6 + $0xe0] ss:$8 sps:$4 sm:$0xff]   ;;  %v460_v42 = vld [vmem:[#allocation6 + $0xf4] ss:$8 sps:$4 sm:$0xff]  }
  0x33   :  { %303 = vmatprep.subr.bf16.mxu0 %v424_v18  ;;  %v462_v43 = vld [vmem:[#allocation6 + $0xf0] ss:$8 sps:$4 sm:$0xff]   ;;  %v128_v11 = vshrl.u32 %v127_v10, 7  ;;  %s511_s15 = scalar_lea.vmem %s360_s14, 256 }
  0x34   :  { %p512_p2 = scmp.ne.s32.totalorder %s360_s14, %s511_s15  ;;  %p517_p4 = scmp.lt.s32.totalorder %s511_s15, %s511_s15 }
  0x35   :  { %v129_v12 = vsub.s32 0, %v128_v11 }
  0x36   :  { %304 = vmatpush1.bf16.msra.mxu0 %v426_v19  ;;  %p518_p5 = por %p517_p4, %p516_p3 }
  0x37   :  { %305 = vmatprep.subr.bf16.mxu0 %v427_v20 }
  0x38   :  { %p519_p6 = pnand %p518_p5, %p512_p2 }
  0x3a   :  { %306 = vmatpush1.bf16.msra.mxu0 %v429_v21 }
  0x3b   :  { %307 = vmatprep.subr.bf16.mxu0 %v430_v22 }
  0x3e   :  { %308 = vmatpush1.bf16.msra.mxu0 %v432_v23 }
  0x3f   :  { %309 = vmatprep.subr.bf16.mxu0 %v433_v24 }
  0x42   :  { %310 = vmatpush1.bf16.msra.mxu0 %v435_v25 }
  0x43   :  { %311 = vmatprep.subr.bf16.mxu0 %v436_v26 }
  0x46   :  { %312 = vmatpush1.bf16.msra.mxu0 %v438_v27 }
  0x47   :  { %313 = vmatprep.subr.bf16.mxu0 %v439_v28 }
  0x4a   :  { %314 = vmatpush1.bf16.msra.mxu0 %v441_v29 }
  0x4b   :  { %315 = vmatprep.subr.bf16.mxu0 %v442_v30 }
  0x4e   :  { %316 = vmatpush1.bf16.msra.mxu0 %v444_v31 }
  0x4f   :  { %317 = vmatprep.subr.bf16.mxu0 %v445_v32 }
  0x52   :  { %318 = vmatpush1.bf16.msra.mxu0 %v447_v33 }
  0x53   :  { %319 = vmatprep.subr.bf16.mxu0 %v448_v34 }
  0x56   :  { %320 = vmatpush1.bf16.msra.mxu0 %v450_v35 }
  0x57   :  { %321 = vmatprep.subr.bf16.mxu0 %v451_v36 }
  0x5a   :  { %322 = vmatpush1.bf16.msra.mxu0 %v453_v37 }
  0x5b   :  { %323 = vmatprep.subr.bf16.mxu0 %v454_v38 }
  0x5e   :  { %324 = vmatpush1.bf16.msra.mxu0 %v456_v39 }
  0x5f   :  { %325 = vmatprep.subr.bf16.mxu0 %v457_v40 }
  0x62   :  { %326 = vmatpush1.bf16.msra.mxu0 %v459_v41 }
  0x63   :  { %327 = vmatprep.subr.bf16.mxu0 %v460_v42 }
  0x66   :  { %328 = vmatpush1.bf16.msra.mxu0 %v462_v43 }
  0xb7   :  { %v53_v44 = vpop.xlane.xlu0 %52 }
  0xb8   :  { %v57_v45 = vmul.f32 0.00390625, %v53_v44 }
  0xb9   :  { %v65_v46 = vpop.xlane.xlu1 %64 }
  0xba   :  { %v69_v47 = vmul.f32 0.00390625, %v65_v46  ;;  %v71_v48 = vmul.f32 %v57_v45, %v57_v45  ;;  %v79_v59 = vsub.f32 %v593_v0, %v57_v45  ;;  %v80_v61 = vsub.f32 %v595_v1, %v57_v45  ;;  %v125_v0 = vld [vmem:[%s637_s2] sm:$0x3] }
  0xbb   :  { %v56_v49 = vpop.xlane.xlu0 %55  ;;  %v130_v1 = vrot.slane %v125_v0, %v129_v12 }
  0xbc   :  { %v73_v50 = vsub.f32 %v69_v47, %v71_v48  ;;  %v58_v51 = vmul.f32 0.00390625, %v56_v49 }
  0xbd   :  { %v68_v52 = vpop.xlane.xlu1 %67 }
  0xbe   :  { %v75_v53 = vadd.f32 1e-05, %v73_v50  ;;  %v70_v54 = vmul.f32 0.00390625, %v68_v52  ;;  %v72_v55 = vmul.f32 %v58_v51, %v58_v51  ;;  %v81_v60 = vsub.f32 %v597_v2, %v58_v51 }
  0xbf   :  { %v82_v62 = vsub.f32 %v605_v6, %v58_v51  ;;  %v133_v2 = vsub.s32 1, %v128_v11 }
  0xc0   :  { %v74_v56 = vsub.f32 %v70_v54, %v72_v55  ;;  %463 = vrsqrt.f32 %v75_v53 }
  0xc1   :  { %v134_v13 = vrot.slane %v125_v0, %v133_v2 }
  0xc2   :  { %v76_v57 = vadd.f32 1e-05, %v74_v56 }
  0xc4   :  { %465 = vrsqrt.f32 %v76_v57 }
  0xca   :  { %v464_v58 = vpop.eup %463 }
  0xcb   :  { %v84_v3 = vmul.f32 %v464_v58, %v80_v61  ;;  %v83_v5 = vmul.f32 %v464_v58, %v79_v59 }
  0xce   :  { %v466_v63 = vpop.eup %465 }
  0xcf   :  { %v86_v4 = vmul.f32 %v466_v63, %v82_v62  ;;  %v85_v7 = vmul.f32 %v466_v63, %v81_v60 }
  0xd1   :  { %v88_v8 = vpack.c.bf16 %v86_v4, %v84_v3  ;;  %v87_v9 = vpack.c.bf16 %v85_v7, %v83_v5 }
  0xd3   :  { %329 = vmatprep.mubr.bf16.mxu0 %v88_v8 }
  0xd4   :  { %330 = vmatmul.mubr.bf16.vlgmr.msra.gmra.mrb[0].mxu0 %v87_v9 }
 0x1a7   :  { %v331_v6 = vpop.f32.mrb[0].mxu0 }
 0x1a8   :  { %v332_v14 = vadd.f32 %v331_v6, %v130_v1  ;;  %v333_v15 = vpop.f32.mrb[1].mxu0 }
 0x1a9   :  { %v334_v16 = vadd.f32 %v333_v15, %v134_v13  ;;  %v335_v17 = vpop.f32.mrb[2].mxu0 }
 0x1aa   :  { %v336_v18 = vadd.f32 %v335_v17, %v130_v1  ;;  %v337_v19 = vpop.f32.mrb[3].mxu0 }
 0x1ab   :  { %v406_v20 = vpack.c.bf16 %v334_v16, %v332_v14  ;;  %v338_v21 = vadd.f32 %v337_v19, %v134_v13 }
 0x1ad   :  { %352 = vst [vmem:[#allocation8] sm:$0xff] %v406_v20  ;;  %v407_v22 = vpack.c.bf16 %v338_v21, %v336_v18 }
 0x1af   :  { %353 = vst [vmem:[#allocation8 + $0x8] sm:$0xff] %v407_v22 }
 0x1b0   :  { %522 = shalt.err (!%p519_p6)
}
 0x1b1   :  { %s523_s17 = scalar_lea.hbm %s638_s3, 256 }
 0x1b2   :  { %p524_p7 = scmp.ne.s32.totalorder %s638_s3, %s523_s17  ;;  %p527_p8 = scmp.lt.u32.totalorder %s523_s17, %s638_s3 }
 0x1b4   :  { %p529_p9 = pnand %p527_p8, %p524_p7 }
 0x1b6   :  { %532 = shalt.err (!%p529_p9)
}
 0x1b7   :  { %365 = dma.vmem_to_hbm [thread:$0]  %s360_s14, 256, %s638_s3, [#allocation5], %s543_s0, %s543_s0, %s544_s9  }
 0x1b8   :  { %537 = dma.done.wait [#allocation5], 256  }
 0x1b9   :  { %538 = vsyncadd [#allocation5], 4294967040 }
 0x1ba   :  { %369 = vsyncpa [#allocation4], 1 }
 0x1bb   :  { %370 = vsyncpa [#allocation7], 1 }
 0x1bc   :  { %371 = vsyncpa [#allocation5], 1 }

</bundles_post_ra>
